<compile_context>
chip_gen: v6e
topology: v6e:2x2x1
jax: 0.10.0
libtpu: 0.0.40
codegen_flags: <defaults>
</compile_context>

<pallas_src>
import functools

import jax
import jax.numpy as jnp
from jax.experimental import pallas as pl
from jax.experimental.pallas import tpu as pltpu


def _round_up(x: int, m: int) -> int:
    return ((x + m - 1) // m) * m


def _rdrop_kernel(l1_ref, l2_ref, t_ref, out_ref, acc_ref, *,
                  batch: int, block_rows: int, kl_weight: float,
                  tiles_per_split: int, total_tiles: int, ragged: bool,
                  final_scale: float):
    i = pl.program_id(1)

    @pl.when(i == 0)
    def _init():
        acc_ref[...] = jnp.zeros_like(acc_ref)

    l1 = l1_ref[...].astype(jnp.float32)
    l2 = l2_ref[...].astype(jnp.float32)
    t = t_ref[...].astype(jnp.float32)

    # --- BCEWithLogits, stable:  max(x,0) - x*y + log1p(exp(-|x|))
    # The two branches' log1p terms are fused into a single log:
    #   log1p(a) + log1p(b) == log((1+a)*(1+b))   (one fewer EUP op / element)
    e1 = jnp.exp(-jnp.abs(l1))
    e2 = jnp.exp(-jnp.abs(l2))
    bce_el = (jnp.maximum(l1, 0.0) - l1 * t) \
           + (jnp.maximum(l2, 0.0) - l2 * t) \
           + jnp.log((1.0 + e1) * (1.0 + e2))

    # --- log_softmax + softmax sharing one exp; probs via a per-row
    # reciprocal (exact) instead of a broadcast divide.
    def lsm_and_probs(x):
        m = jnp.max(x, axis=-1, keepdims=True)
        z = x - m
        ez = jnp.exp(z)
        s = jnp.sum(ez, axis=-1, keepdims=True)
        lp = z - jnp.log(s)
        p = ez * pl.reciprocal(s)
        return lp, p

    lp1, p1 = lsm_and_probs(l1)
    lp2, p2 = lsm_and_probs(l2)

    # --- symmetric KL fused: p2*(lp2-lp1) + p1*(lp1-lp2) == (p2-p1)*(lp2-lp1)
    kl_el = (p2 - p1) * (lp2 - lp1)

    # Static scale folding: overall 'mean' factor 1/(2*B*C) is applied once at
    # finalize; the per-element ratio kl_scale/bce_scale folds to kl_weight.
    if kl_weight == 1.0:
        combined = bce_el + kl_el
    else:
        combined = bce_el + kl_weight * kl_el

    if not ragged:
        acc_ref[...] += combined
    else:
        c = pl.program_id(0)
        global_tile = c * tiles_per_split + i
        is_last_tile = global_tile == (total_tiles - 1)

        @pl.when(jnp.logical_not(is_last_tile))
        def _full():
            acc_ref[...] += combined

        @pl.when(is_last_tile)
        def _masked():
            row_ids = global_tile * block_rows + jax.lax.broadcasted_iota(
                jnp.int32, combined.shape, 0)
            acc_ref[...] += jnp.where(row_ids < batch, combined, 0.0)

    @pl.when(i == tiles_per_split - 1)
    def _finalize():
        total = jnp.sum(acc_ref[...]) * final_scale
        out_ref[...] = jnp.broadcast_to(total, out_ref.shape)


def rdrop_loss(logits1, logits2, target, kl_weight: float = 1.0,
               block_rows: int | None = None, num_splits: int | None = None):
    """Pallas implementation of RDrop.forward. Returns a scalar (shape ()) f32."""
    assert logits1.shape == logits2.shape == target.shape
    assert logits1.ndim == 2
    B, C = logits1.shape
    MiB = 1 << 20

    in_dtypes = (logits1.dtype, logits2.dtype, target.dtype)
    # Sublane packing multiple: 8 rows for 4-byte dtypes, 16 for bf16, 32 for 1B.
    mult = max(max(8, 32 // max(jnp.dtype(d).itemsize, 1)) for d in in_dtypes)

    # ---- Generation-aware VMEM plan -------------------------------------
    try:
        phys_vmem = int(pltpu.get_tpu_info().vmem_capacity_bytes)
        if phys_vmem <= 0:
            raise ValueError(phys_vmem)
    except Exception:
        phys_vmem = 64 * MiB            # conservative fallback (v7x per-core)
    # Plan against ~half of physical VMEM: v5e/v6e (128 MiB) -> 64 MiB,
    # v7x (64 MiB) -> 32 MiB. Never below 32 MiB, never above 96 MiB.
    plan_limit = min(96 * MiB, max(32 * MiB, phys_vmem // 2))

    # Per-tile-row bytes: double-buffered pipeline copies at the real HBM
    # dtype + persistent f32 accumulator + live f32 intermediates headroom.
    per_row_bytes = sum(2 * C * jnp.dtype(d).itemsize for d in in_dtypes)
    per_row_bytes += C * 4          # (block_rows, C) f32 accumulator scratch
    per_row_bytes += 10 * C * 4     # f32 casts / softmax / bce intermediates

    if block_rows is None:
        budget = int(plan_limit * 0.8)
        block_rows = budget // max(per_row_bytes, 1)
        block_rows = min(2048, block_rows)
    block_rows = max(mult, (block_rows // mult) * mult)
    block_rows = min(block_rows, _round_up(B, mult))

    total_tiles = pl.cdiv(B, block_rows)
    ragged = (B % block_rows) != 0

    # Two-way batch split across a leading "parallel" grid axis (uses both
    # TensorCores on v7x / megacore parts; harmless sequential work otherwise).
    if num_splits is None:
        num_splits = 2
    if num_splits < 1 or total_tiles < num_splits or total_tiles % num_splits != 0:
        num_splits = 1
    tiles_per_split = total_tiles // num_splits

    vmem_limit = int(min(max(plan_limit, per_row_bytes * block_rows + 2 * MiB),
                         max(phys_vmem - 4 * MiB, 32 * MiB)))

    kernel = functools.partial(
        _rdrop_kernel,
        batch=B, block_rows=block_rows, kl_weight=float(kl_weight),
        tiles_per_split=tiles_per_split, total_tiles=total_tiles,
        ragged=ragged, final_scale=1.0 / (2.0 * B * C),
    )

    in_spec = pl.BlockSpec((block_rows, C),
                           lambda c, i: (c * tiles_per_split + i, 0))
    out = pl.pallas_call(
        kernel,
        out_shape=jax.ShapeDtypeStruct((num_splits, 8, 128), jnp.float32),
        grid_spec=pltpu.PrefetchScalarGridSpec(
            num_scalar_prefetch=0,
            grid=(num_splits, tiles_per_split),
            in_specs=[in_spec, in_spec, in_spec],
            out_specs=pl.BlockSpec((1, 8, 128), lambda c, i: (c, 0, 0)),
            scratch_shapes=[pltpu.VMEM((block_rows, C), jnp.float32)],
        ),
        compiler_params=pltpu.CompilerParams(
            dimension_semantics=("parallel", "arbitrary"),
            vmem_limit_bytes=vmem_limit,
        ),
    )(logits1, logits2, target)
    # Each split already carries the 1/(2*B*C) scale; sum the partials.
    return jnp.sum(out[:, 0, 0])


def _ref(l1, l2, t, w=1.0):
    def bce(x, y):
        return jnp.mean(jnp.maximum(x, 0.0) - x * y + jnp.log1p(jnp.exp(-jnp.abs(x))))

    lp1 = jax.nn.log_softmax(l1, axis=-1)
    lp2 = jax.nn.log_softmax(l2, axis=-1)
    kl1 = jnp.mean(jnp.exp(lp2) * (lp2 - lp1))
    kl2 = jnp.mean(jnp.exp(lp1) * (lp1 - lp2))
    return (bce(l1, t) + bce(l2, t)) / 2.0 + w * (kl1 + kl2) / 2.0


if __name__ == "__main__":
    key = jax.random.PRNGKey(0)
    ks = jax.random.split(key, 9)

    # Case 1: small, tile-aligned, auto tile sizing, kl_weight=1 (fold path).
    B1, C1 = 8, 32
    a1 = jax.random.normal(ks[0], (B1, C1), jnp.float32)
    a2 = jax.random.normal(ks[1], (B1, C1), jnp.float32)
    at = jax.random.bernoulli(ks[2], 0.5, (B1, C1)).astype(jnp.float32)
    got1 = jax.jit(rdrop_loss)(a1, a2, at)
    jax.block_until_ready(got1)
    ref1 = _ref(a1, a2, at)
    assert jnp.allclose(got1, ref1, rtol=1e-5, atol=1e-5), (got1, ref1)

    # Case 2: ragged batch (B=12), forced 8-row tiles -> 2 tiles, exercises
    # the two-way parallel split, the masked last tile, and kl_weight != 1.
    B2, C2 = 12, 32
    b1 = jax.random.normal(ks[3], (B2, C2), jnp.float32)
    b2 = jax.random.normal(ks[4], (B2, C2), jnp.float32)
    bt = jax.random.bernoulli(ks[5], 0.5, (B2, C2)).astype(jnp.float32)
    got2 = jax.jit(functools.partial(rdrop_loss, kl_weight=0.5, block_rows=8))(b1, b2, bt)
    jax.block_until_ready(got2)
    ref2 = _ref(b1, b2, bt, w=0.5)
    assert jnp.allclose(got2, ref2, rtol=1e-5, atol=1e-5), (got2, ref2)

    # Case 3: bf16 logits + f32 targets (dtype-aware tile sizing / 16-row packing).
    B3, C3 = 32, 128
    c1 = jax.random.normal(ks[6], (B3, C3), jnp.float32).astype(jnp.bfloat16)
    c2 = jax.random.normal(ks[7], (B3, C3), jnp.float32).astype(jnp.bfloat16)
    ct = jax.random.bernoulli(ks[8], 0.5, (B3, C3)).astype(jnp.float32)
    got3 = jax.jit(rdrop_loss)(c1, c2, ct)
    jax.block_until_ready(got3)
    ref3 = _ref(c1.astype(jnp.float32), c2.astype(jnp.float32), ct)
    assert jnp.allclose(got3, ref3, rtol=1e-5, atol=1e-5), (got3, ref3)

    print("KERNEL_OK")
</pallas_src>

<mosaic_0001>
module attributes {stable_mosaic.version = 11 : i64} {
  func.func @_rdrop_kernel(%arg0: i32, %arg1: i32, %arg2: memref<8x32xf32, #tpu.memory_space<vmem>>, %arg3: memref<8x32xf32, #tpu.memory_space<vmem>>, %arg4: memref<8x32xf32, #tpu.memory_space<vmem>>, %arg5: memref<1x8x128xf32, #tpu.memory_space<vmem>>, %arg6: memref<8x32xf32, #tpu.memory_space<vmem>>) attributes {dimension_semantics = [#tpu.dimension_semantics<parallel>, #tpu.dimension_semantics<arbitrary>], iteration_bounds = array<i64: 1, 1>, scalar_prefetch = 0 : i64, scratch_operands = 1 : i64, tpu.core_type = #tpu.core_type<tc>, window_params = [{transform_indices = @transform_0, window_bounds = array<i64: 8, 32>}, {transform_indices = @transform_1, window_bounds = array<i64: 8, 32>}, {transform_indices = @transform_2, window_bounds = array<i64: 8, 32>}, {transform_indices = @transform_3, window_bounds = array<i64: 1, 8, 128>}]} {
    %c0_i32 = arith.constant 0 : i32
    %0 = arith.cmpi eq, %arg1, %c0_i32 : i32
    %1 = arith.extui %0 : i1 to i32
    %c0_i32_0 = arith.constant 0 : i32
    %2 = arith.cmpi ne, %1, %c0_i32_0 : i32
    scf.if %2 {
      %cst_21 = arith.constant 0.000000e+00 : f32
      %66 = vector.broadcast %cst_21 : f32 to vector<8x32xf32>
      %c0_22 = arith.constant 0 : index
      %c0_23 = arith.constant 0 : index
      %67 = vector.load %arg6[%c0_22, %c0_23] : memref<8x32xf32, #tpu.memory_space<vmem>>, vector<8x32xf32>
      tpu.vector_store %arg6[%c0_22, %c0_23], %66 {strides = array<i32>} : memref<8x32xf32, #tpu.memory_space<vmem>>, vector<8x32xf32>,
    } else {
    }
    %c0 = arith.constant 0 : index
    %c0_1 = arith.constant 0 : index
    %3 = vector.load %arg2[%c0, %c0_1] : memref<8x32xf32, #tpu.memory_space<vmem>>, vector<8x32xf32>
    %c0_2 = arith.constant 0 : index
    %c0_3 = arith.constant 0 : index
    %4 = vector.load %arg3[%c0_2, %c0_3] : memref<8x32xf32, #tpu.memory_space<vmem>>, vector<8x32xf32>
    %c0_4 = arith.constant 0 : index
    %c0_5 = arith.constant 0 : index
    %5 = vector.load %arg4[%c0_4, %c0_5] : memref<8x32xf32, #tpu.memory_space<vmem>>, vector<8x32xf32>
    %6 = math.absf %3 : vector<8x32xf32>
    %cst = arith.constant 0.000000e+00 : f32
    %7 = vector.broadcast %cst : f32 to vector<8x32xf32>
    %8 = arith.subf %7, %6 : vector<8x32xf32>
    %9 = math.exp %8 : vector<8x32xf32>
    %10 = math.absf %4 : vector<8x32xf32>
    %cst_6 = arith.constant 0.000000e+00 : f32
    %11 = vector.broadcast %cst_6 : f32 to vector<8x32xf32>
    %12 = arith.subf %11, %10 : vector<8x32xf32>
    %13 = math.exp %12 : vector<8x32xf32>
    %cst_7 = arith.constant 0.000000e+00 : f32
    %14 = vector.broadcast %cst_7 : f32 to vector<8x32xf32>
    %15 = arith.maximumf %3, %14 : vector<8x32xf32>
    %16 = arith.mulf %3, %5 : vector<8x32xf32>
    %17 = arith.subf %15, %16 : vector<8x32xf32>
    %cst_8 = arith.constant 0.000000e+00 : f32
    %18 = vector.broadcast %cst_8 : f32 to vector<8x32xf32>
    %19 = arith.maximumf %4, %18 : vector<8x32xf32>
    %20 = arith.mulf %4, %5 : vector<8x32xf32>
    %21 = arith.subf %19, %20 : vector<8x32xf32>
    %22 = arith.addf %17, %21 : vector<8x32xf32>
    %cst_9 = arith.constant 1.000000e+00 : f32
    %23 = vector.broadcast %cst_9 : f32 to vector<8x32xf32>
    %24 = arith.addf %23, %9 : vector<8x32xf32>
    %cst_10 = arith.constant 1.000000e+00 : f32
    %25 = vector.broadcast %cst_10 : f32 to vector<8x32xf32>
    %26 = arith.addf %25, %13 : vector<8x32xf32>
    %27 = arith.mulf %24, %26 : vector<8x32xf32>
    %28 = math.log %27 : vector<8x32xf32>
    %29 = arith.addf %22, %28 : vector<8x32xf32>
    %cst_11 = arith.constant dense<0xFF800000> : vector<8xf32>
    %30 = vector.multi_reduction <maximumf>, %3, %cst_11 [1] : vector<8x32xf32> to vector<8xf32>
    %31 = vector.shape_cast %30 : vector<8xf32> to vector<8x1xf32>
    %32 = vector.broadcast %31 : vector<8x1xf32> to vector<8x32xf32>
    %33 = arith.subf %3, %32 : vector<8x32xf32>
    %34 = math.exp %33 : vector<8x32xf32>
    %cst_12 = arith.constant dense<0.000000e+00> : vector<8xf32>
    %35 = vector.multi_reduction <add>, %34, %cst_12 [1] : vector<8x32xf32> to vector<8xf32>
    %36 = vector.shape_cast %35 : vector<8xf32> to vector<8x1xf32>
    %37 = math.log %36 : vector<8x1xf32>
    %38 = vector.broadcast %37 : vector<8x1xf32> to vector<8x32xf32>
    %39 = arith.subf %33, %38 : vector<8x32xf32>
    %40 = tpu.reciprocal %36 : vector<8x1xf32> -> vector<8x1xf32>
    %41 = vector.broadcast %40 : vector<8x1xf32> to vector<8x32xf32>
    %42 = arith.mulf %34, %41 : vector<8x32xf32>
    %cst_13 = arith.constant dense<0xFF800000> : vector<8xf32>
    %43 = vector.multi_reduction <maximumf>, %4, %cst_13 [1] : vector<8x32xf32> to vector<8xf32>
    %44 = vector.shape_cast %43 : vector<8xf32> to vector<8x1xf32>
    %45 = vector.broadcast %44 : vector<8x1xf32> to vector<8x32xf32>
    %46 = arith.subf %4, %45 : vector<8x32xf32>
    %47 = math.exp %46 : vector<8x32xf32>
    %cst_14 = arith.constant dense<0.000000e+00> : vector<8xf32>
    %48 = vector.multi_reduction <add>, %47, %cst_14 [1] : vector<8x32xf32> to vector<8xf32>
    %49 = vector.shape_cast %48 : vector<8xf32> to vector<8x1xf32>
    %50 = math.log %49 : vector<8x1xf32>
    %51 = vector.broadcast %50 : vector<8x1xf32> to vector<8x32xf32>
    %52 = arith.subf %46, %51 : vector<8x32xf32>
    %53 = tpu.reciprocal %49 : vector<8x1xf32> -> vector<8x1xf32>
    %54 = vector.broadcast %53 : vector<8x1xf32> to vector<8x32xf32>
    %55 = arith.mulf %47, %54 : vector<8x32xf32>
    %56 = arith.subf %55, %42 : vector<8x32xf32>
    %57 = arith.subf %52, %39 : vector<8x32xf32>
    %58 = arith.mulf %56, %57 : vector<8x32xf32>
    %59 = arith.addf %29, %58 : vector<8x32xf32>
    %c0_15 = arith.constant 0 : index
    %c0_16 = arith.constant 0 : index
    %60 = vector.load %arg6[%c0_15, %c0_16] : memref<8x32xf32, #tpu.memory_space<vmem>>, vector<8x32xf32>
    %61 = arith.addf %60, %59 : vector<8x32xf32>
    %c0_17 = arith.constant 0 : index
    %c0_18 = arith.constant 0 : index
    %62 = vector.load %arg6[%c0_17, %c0_18] : memref<8x32xf32, #tpu.memory_space<vmem>>, vector<8x32xf32>
    tpu.vector_store %arg6[%c0_17, %c0_18], %61 {strides = array<i32>} : memref<8x32xf32, #tpu.memory_space<vmem>>, vector<8x32xf32>,
    %c0_i32_19 = arith.constant 0 : i32
    %63 = arith.cmpi eq, %arg1, %c0_i32_19 : i32
    %64 = arith.extui %63 : i1 to i32
    %c0_i32_20 = arith.constant 0 : i32
    %65 = arith.cmpi ne, %64, %c0_i32_20 : i32
    scf.if %65 {
      %c0_21 = arith.constant 0 : index
      %c0_22 = arith.constant 0 : index
      %66 = vector.load %arg6[%c0_21, %c0_22] : memref<8x32xf32, #tpu.memory_space<vmem>>, vector<8x32xf32>
      %67 = vector.shape_cast %66 : vector<8x32xf32> to vector<1x8x32xf32>
      %cst_23 = arith.constant dense<0.000000e+00> : vector<1xf32>
      %68 = vector.multi_reduction <add>, %67, %cst_23 [1, 2] : vector<1x8x32xf32> to vector<1xf32>
      %69 = vector.shape_cast %68 : vector<1xf32> to vector<1x1x1xf32>
      %70 = vector.extract %69[0, 0, 0] : f32 from vector<1x1x1xf32>
      %cst_24 = arith.constant 0.001953125 : f32
      %71 = arith.mulf %70, %cst_24 : f32
      %72 = vector.broadcast %71 : f32 to vector<1x8x128xf32>
      %c0_25 = arith.constant 0 : index
      %c0_26 = arith.constant 0 : index
      %c0_27 = arith.constant 0 : index
      %73 = vector.load %arg5[%c0_25, %c0_26, %c0_27] : memref<1x8x128xf32, #tpu.memory_space<vmem>>, vector<1x8x128xf32>
      tpu.vector_store %arg5[%c0_25, %c0_26, %c0_27], %72 {strides = array<i32>} : memref<1x8x128xf32, #tpu.memory_space<vmem>>, vector<1x8x128xf32>,
    } else {
    }
    return
  }
  func.func @transform_0(%arg0: i32, %arg1: i32) -> (i32, i32) {
    %c1_i32 = arith.constant 1 : i32
    %0 = arith.muli %arg0, %c1_i32 : i32
    %1 = arith.addi %0, %arg1 : i32
    %c0_i32 = arith.constant 0 : i32
    %c0_i32_0 = arith.constant 0 : i32
    return %1, %c0_i32 : i32, i32
  }
  func.func @transform_1(%arg0: i32, %arg1: i32) -> (i32, i32) {
    %c1_i32 = arith.constant 1 : i32
    %0 = arith.muli %arg0, %c1_i32 : i32
    %1 = arith.addi %0, %arg1 : i32
    %c0_i32 = arith.constant 0 : i32
    %c0_i32_0 = arith.constant 0 : i32
    return %1, %c0_i32 : i32, i32
  }
  func.func @transform_2(%arg0: i32, %arg1: i32) -> (i32, i32) {
    %c1_i32 = arith.constant 1 : i32
    %0 = arith.muli %arg0, %c1_i32 : i32
    %1 = arith.addi %0, %arg1 : i32
    %c0_i32 = arith.constant 0 : i32
    %c0_i32_0 = arith.constant 0 : i32
    return %1, %c0_i32 : i32, i32
  }
  func.func @transform_3(%arg0: i32, %arg1: i32) -> (i32, i32, i32) {
    %c0_i32 = arith.constant 0 : i32
    %c0_i32_0 = arith.constant 0 : i32
    %c0_i32_1 = arith.constant 0 : i32
    return %arg0, %c0_i32, %c0_i32_0 : i32, i32, i32
  }
}

</mosaic_0001>

<bundles_post_ra>
// kernel: rdrop_loss.1
= control target key start
LH: loop header
LB: loop body
LE: loop exit
PB: predicated region body
PF: predicated region fallthrough
CT: control target
= control target key end

     0   :  { %8 = vsyncpa [#allocation4], 0  ;;  %s281_s0 = inlined_call_operand.hbm [shape: f32[8,32], index: 0, kind: input, shape index: {}]   ;;  %s282_s1 = inlined_call_operand.hbm [shape: f32[8,32], index: 1, kind: input, shape index: {}]   ;;  %s283_s2 = inlined_call_operand.hbm [shape: f32[8,32], index: 2, kind: input, shape index: {}]   ;;  %s284_s3 = inlined_call_operand.vmem [shape: f32[1,8,128], index: 3, kind: output, shape index: {}]  }
   0x1   :  { %9 = vsyncpa [#allocation6], 0  ;;  %s238_s12 = smov [#allocation5]   ;;  %s239_s14 = smov [#allocation3]  }
   0x2   :  { %s32_s13 = sshll.u32 %s238_s12, 4  ;;  %s19_s15 = sshll.u32 %s239_s14, 4  ;;  %s33_s13 = int_to_ptr.vmem [resolvable:$true] %s32_s13  ;;  %s20_s15 = int_to_ptr.vmem [resolvable:$true] %s19_s15 }
   0x3   :  { %s182_s16 = scalar_lea.vmem %s33_s13, 128  ;;  %p187_p1 = scmp.lt.s32.totalorder %s33_s13, %s33_s13 }
   0x4   :  { %p183_p0 = scmp.ne.s32.totalorder %s33_s13, %s182_s16  ;;  %p188_p2 = scmp.lt.s32.totalorder %s182_s16, %s182_s16 }
   0x6   :  { %p189_p3 = por %p188_p2, %p187_p1 }
   0x8   :  { %p190_p4 = pnand %p189_p3, %p183_p0 }
   0xa   :  { %193 = shalt.err (!%p190_p4)
}
   0xb   :  { %35 = dma.hbm_to_vmem [thread:$0]  %s282_s1, 128, %s33_s13, [#allocation6]  }
   0xc   :  { %s202_s19 = scalar_lea.vmem %s20_s15, 128  ;;  %p207_p6 = scmp.lt.s32.totalorder %s20_s15, %s20_s15 }
   0xd   :  { %p203_p5 = scmp.ne.s32.totalorder %s20_s15, %s202_s19  ;;  %p208_p7 = scmp.lt.s32.totalorder %s202_s19, %s202_s19 }
   0xf   :  { %p209_p8 = por %p208_p7, %p207_p6 }
  0x11   :  { %p210_p9 = pnand %p209_p8, %p203_p5 }
  0x13   :  { %213 = shalt.err (!%p210_p9)
}
  0x14   :  { %22 = dma.hbm_to_vmem [thread:$0]  %s281_s0, 128, %s20_s15, [#allocation4]  }
  0x15   :  { %s240_s22 = smov [#allocation7]  }
  0x16   :  { %s45_s23 = sshll.u32 %s240_s22, 4  ;;  %s46_s23 = int_to_ptr.vmem [resolvable:$true] %s45_s23 }
  0x17   :  { %s222_s24 = scalar_lea.vmem %s46_s23, 128  ;;  %p227_p11 = scmp.lt.s32.totalorder %s46_s23, %s46_s23 }
  0x18   :  { %p223_p10 = scmp.ne.s32.totalorder %s46_s23, %s222_s24  ;;  %p228_p12 = scmp.lt.s32.totalorder %s222_s24, %s222_s24 }
  0x1a   :  { %p229_p13 = por %p228_p12, %p227_p11 }
  0x1c   :  { %p230_p0 = pnand %p229_p13, %p223_p10 }
  0x1e   :  { %233 = shalt.err (!%p230_p0)
}
  0x1f   :  { %48 = dma.hbm_to_vmem [thread:$0]  %s283_s2, 128, %s46_s23, [#allocation6]  }
  0x20   :  { %234 = dma.done.wait [#allocation4], 128  }
  0x21   :  { %235 = vsyncadd [#allocation4], 4294967168 }
  0x22   :  { %236 = dma.done.wait [#allocation6], 256  }
  0x23   :  { %237 = vsyncadd [#allocation6], 4294967040  ;;  %vm65_vm0 = vcmask 261120   ;;  %v241_v0 = vmov 0.0   ;;  %v67_v1 = vld [vmem:[#allocation3] sm:$0xff]  ;;  %v68_v2 = vld [vmem:[#allocation5] sm:$0xff] }
  0x24   :  { %66 = vst.msk [vmem:[#allocation2] sm:$0xff] %vm65_vm0, %v241_v0  ;;  %v92_v3 = vsel %vm65_vm0, %v67_v1, -inf  ;;  %v106_v4 = vsel %vm65_vm0, %v68_v2, -inf  ;;  %v70_v15 = vand.u32 2147483647, %v67_v1  ;;  %v69_v28 = vld [vmem:[#allocation7] sm:$0xff] }
  0x25   :  { %93 = vmax.xlane.f32.xlu0 %v92_v3  ;;  %v74_v16 = vand.u32 2147483647, %v68_v2  ;;  %v78_v29 = vmax.f32 %v67_v1, 0.0  ;;  %v79_v30 = vmul.f32 %v69_v28, %v67_v1  ;;  %v81_v31 = vmax.f32 %v68_v2, 0.0 }
  0x26   :  { %v71_v17 = vsub.f32 0.0, %v70_v15  ;;  %v82_v32 = vmul.f32 %v69_v28, %v68_v2 }
  0x27   :  { %v75_v18 = vsub.f32 0.0, %v74_v16  ;;  %v80_v34 = vsub.f32 %v78_v29, %v79_v30 }
  0x28   :  { %v72_v19 = vmul.f32 1.442695, %v71_v17  ;;  %v83_v35 = vsub.f32 %v81_v31, %v82_v32 }
  0x29   :  { %107 = vmax.xlane.f32.xlu0 %v106_v4  ;;  %v76_v20 = vmul.f32 1.442695, %v75_v18 }
  0x2a   :  { %v84_v41 = vadd.f32 %v83_v35, %v80_v34 }
  0x2b   :  { %v124_v52 = vld [vmem:[#allocation2] sm:$0xff] }
  0xae   :  { %v94_v5 = vpop.xlane.xlu0 %93 }
  0xaf   :  { %v95_v6 = vsub.f32 %v67_v1, %v94_v5 }
  0xb1   :  { %v96_v7 = vmul.f32 1.442695, %v95_v6 }
  0xb2   :  { %v108_v8 = vpop.xlane.xlu0 %107 }
  0xb3   :  { %156 = vpow2.f32 %v96_v7  ;;  %v109_v9 = vsub.f32 %v68_v2, %v108_v8 }
  0xb5   :  { %v110_v10 = vmul.f32 1.442695, %v109_v9 }
  0xb7   :  { %158 = vpow2.f32 %v110_v10 }
  0xb8   :  { %160 = vpow2.f32 %v72_v19 }
  0xb9   :  { %162 = vpow2.f32 %v76_v20 }
  0xc0   :  { %v157_v11 = vpop.eup %156 }
  0xc1   :  { %v98_v12 = vsel %vm65_vm0, %v157_v11, 0.0 }
  0xc2   :  { %99 = vadd.xlane.f32.xlu1 %v98_v12 }
  0xc4   :  { %v159_v13 = vpop.eup %158 }
  0xc5   :  { %v112_v14 = vsel %vm65_vm0, %v159_v13, 0.0  ;;  %v161_v21 = vpop.eup %160 }
  0xc6   :  { %113 = vadd.xlane.f32.xlu1 %v112_v14  ;;  %v163_v22 = vpop.eup %162  ;;  %v85_v23 = vadd.f32 1.0, %v161_v21 }
  0xc7   :  { %v86_v24 = vadd.f32 1.0, %v163_v22 }
  0xc9   :  { %v87_v25 = vmul.f32 %v86_v24, %v85_v23 }
 0x14b   :  { %v100_v26 = vpop.xlane.xlu1 %99 }
 0x14c   :  { %164 = vlog2.f32 %v100_v26 }
 0x14d   :  { %166 = vlog2.f32 %v87_v25 }
 0x14e   :  { %168 = vrcp.f32 %v100_v26 }
 0x14f   :  { %v114_v27 = vpop.xlane.xlu1 %113 }
 0x150   :  { %170 = vlog2.f32 %v114_v27 }
 0x151   :  { %172 = vrcp.f32 %v114_v27 }
 0x159   :  { %v165_v33 = vpop.eup %164 }
 0x15a   :  { %v167_v36 = vpop.eup %166  ;;  %v102_v38 = vmul.f32 0.6931472, %v165_v33 }
 0x15b   :  { %v169_v37 = vpop.eup %168  ;;  %v89_v42 = vmul.f32 0.6931472, %v167_v36 }
 0x15c   :  { %v103_v45 = vsub.f32 %v95_v6, %v102_v38  ;;  %v105_v46 = vmul.f32 %v169_v37, %v157_v11 }
 0x15d   :  { %v171_v39 = vpop.eup %170  ;;  %v90_v48 = vadd.f32 %v89_v42, %v84_v41 }
 0x15e   :  { %v173_v40 = vpop.eup %172  ;;  %v116_v43 = vmul.f32 0.6931472, %v171_v39 }
 0x15f   :  { %v119_v44 = vmul.f32 %v173_v40, %v159_v13 }
 0x160   :  { %v117_v47 = vsub.f32 %v109_v9, %v116_v43 }
 0x161   :  { %v120_v49 = vsub.f32 %v119_v44, %v105_v46 }
 0x162   :  { %v121_v50 = vsub.f32 %v117_v47, %v103_v45 }
 0x164   :  { %v122_v51 = vmul.f32 %v121_v50, %v120_v49 }
 0x166   :  { %v123_v53 = vadd.f32 %v122_v51, %v90_v48 }
 0x168   :  { %v125_v54 = vadd.f32 %v124_v52, %v123_v53 }
 0x16a   :  { %126 = vst.msk [vmem:[#allocation2] sm:$0xff] %vm65_vm0, %v125_v54 }
 0x171   :  { %v130_v55 = vld [vmem:[#allocation2] sm:$0xff] }
 0x172   :  { %v131_v56 = vsel %vm65_vm0, %v130_v55, 0.0 }
 0x173   :  { %132 = vadd.xlane.f32.xlu0 %v131_v56 }
 0x1fc   :  { %v133_v57 = vpop.xlane.xlu0 %132 }
 0x1fd   :  { %v134_v58 = vrot.slane %v133_v57, 4 }
 0x1ff   :  { %v135_v59 = vadd.f32 %v134_v58, %v133_v57 }
 0x201   :  { %v136_v60 = vrot.slane %v135_v59, 2 }
 0x203   :  { %v137_v61 = vadd.f32 %v136_v60, %v135_v59 }
 0x205   :  { %v138_v62 = vrot.slane %v137_v61, 1 }
 0x207   :  { %v139_v63 = vadd.f32 %v138_v62, %v137_v61 }
 0x209   :  { %150 = vpush %v139_v63 }
 0x23a   :  { %s151_s0 = spop %150 }
 0x23b   :  { %s141_s2 = smul.f32 0.001953125, %s151_s0 }
 0x23d   :  { %v142_v0 = vstv %s141_s2 }
 0x23e   :  { %143 = vst [vmem:[%s284_s3] sm:$0xff] %v142_v0 }
 0x23f   :  { %148 = vsyncpa [#allocation4], 1 }
 0x240   :  { %149 = vsyncpa [#allocation6], 1 }

</bundles_post_ra>
